<compile_context>
chip_gen: v7x
topology: tpu7x:2x2x1
jax: 0.10.0
libtpu: 0.0.40
codegen_flags: <defaults>
</compile_context>

<pallas_src>
import functools

import jax
import jax.numpy as jnp
from jax import lax
from jax.experimental import pallas as pl
from jax.experimental.pallas import tpu as pltpu

LANES = 128
STRIP_ROWS = 64            # rows per inner strip: 64x128 f32 = 8 vregs/operand
TARGET_BLOCK_ROWS = 8192   # (8192, 128) f32 = 4 MiB per input per pipeline buffer


def _round_up(x, m):
    return ((x + m - 1) // m) * m


def _tensorcores_per_chip():
    """Best-effort TensorCores/chip (v7x: 2, v5e/v6e: 1). Fallback 1 is always safe."""
    try:
        dev = jax.devices()[0]
    except Exception:
        return 1
    for attr in ("num_cores", "core_count", "num_tensorcores"):
        v = getattr(dev, attr, None)
        if isinstance(v, int) and 1 <= v <= 16:
            return v
    kind = str(getattr(dev, "device_kind", "")).lower()
    return 2 if "v7" in kind else 1


def _weighted_loss_kernel(clean_ref, ann_ref, pred_ref, num_ref, den_ref, *,
                          alpha, beta, block_rows, steps_per_shard,
                          rows_valid, tail_cols, mask_from, grid_blocks):
    shard = pl.program_id(0)
    step = pl.program_id(1)

    # Zero this shard's resident (8,128) accumulator blocks on its first step.
    @pl.when(step == 0)
    def _():
        num_ref[...] = jnp.zeros_like(num_ref)
        den_ref[...] = jnp.zeros_like(den_ref)

    blk = shard * steps_per_shard + step
    nstrips = block_rows // STRIP_ROWS
    alpha_f = jnp.float32(alpha)
    beta_f = jnp.float32(beta)
    zeros = jnp.zeros((8, LANES), jnp.float32)

    def accumulate(masked, rem_rows=None):
        # Strip loop: stream 64-row slices VMEM->vregs, accumulate per-lane
        # partial sums in vreg-resident (8,128) carries (no block-sized temps).
        def body(i, carry):
            num_acc, den_acc = carry
            start = pl.multiple_of(i * STRIP_ROWS, STRIP_ROWS)
            c = clean_ref[pl.ds(start, STRIP_ROWS), :].astype(jnp.float32)
            a = ann_ref[pl.ds(start, STRIP_ROWS), :].astype(jnp.float32)
            p = pred_ref[pl.ds(start, STRIP_ROWS), :].astype(jnp.float32)
            wm = jnp.where(a != c, alpha_f, beta_f)
            err = c - p
            we = wm * (err * err)
            if masked:
                # Only emitted for the tail / phantom blocks (statically gated
                # below): mask rows/cols beyond the valid element count.
                row = start + lax.broadcasted_iota(jnp.int32, (STRIP_ROWS, LANES), 0)
                col = lax.broadcasted_iota(jnp.int32, (STRIP_ROWS, LANES), 1)
                keep = (row < rem_rows - 1) | ((row == rem_rows - 1) & (col < tail_cols))
                wm = jnp.where(keep, wm, 0.0)
                we = jnp.where(keep, we, 0.0)
            num_acc = num_acc + we.reshape(-1, 8, LANES).sum(axis=0)
            den_acc = den_acc + wm.reshape(-1, 8, LANES).sum(axis=0)
            return num_acc, den_acc

        num_acc, den_acc = lax.fori_loop(0, nstrips, body, (zeros, zeros))
        num_ref[...] += num_acc
        den_ref[...] += den_acc

    if mask_from >= grid_blocks:
        # Every block in the grid is fully valid: never emit the mask code.
        accumulate(masked=False)
    elif mask_from <= 0:
        # Every block may contain padding (tiny-input case): masked path only.
        accumulate(masked=True, rem_rows=rows_valid - blk * block_rows)
    else:
        @pl.when(blk < mask_from)
        def _():
            accumulate(masked=False)

        @pl.when(blk >= mask_from)
        def _():
            accumulate(masked=True, rem_rows=rows_valid - blk * block_rows)


def weighted_loss(clean, annotated, predicted, alpha=5.0, beta=1.0):
    assert clean.shape == annotated.shape == predicted.shape
    n = int(clean.size)
    assert n > 0

    rows_valid = pl.cdiv(n, LANES)
    tail_cols = n - (rows_valid - 1) * LANES              # valid cols in last row, in (0,128]
    block_rows = min(TARGET_BLOCK_ROWS, _round_up(rows_valid, STRIP_ROWS))
    rows_padded = max(rows_valid, block_rows)              # pad rows only for sub-block inputs

    steps_total = pl.cdiv(rows_valid, block_rows)
    cores = _tensorcores_per_chip()
    num_shards = 2 if (cores >= 2 and steps_total >= 2) else 1
    steps_per_shard = pl.cdiv(steps_total, num_shards)
    grid_blocks = num_shards * steps_per_shard
    # First block index containing any invalid (padded / out-of-range) element.
    aligned = (rows_valid % block_rows == 0) and (tail_cols == LANES)
    mask_from = steps_total if aligned else steps_total - 1

    def prep(x):
        # Keep native f32/bf16 (stream narrow dtypes as-is; up-cast in-kernel).
        if x.dtype != jnp.float32 and x.dtype != jnp.bfloat16:
            x = x.astype(jnp.float32)
        x = jnp.ravel(x)
        pad = rows_padded * LANES - n
        if pad:  # only when n % 128 != 0 or the whole input is < one block
            x = jnp.pad(x, (0, pad))
        return x.reshape(rows_padded, LANES)

    c2, a2, p2 = prep(clean), prep(annotated), prep(predicted)

    last_block = steps_total - 1
    # Clamp so phantom blocks (odd steps_total on 2 shards) never DMA out of bounds;
    # their contribution is masked to zero in-kernel.
    in_spec = pl.BlockSpec(
        (block_rows, LANES),
        lambda s, k: (jnp.minimum(s * steps_per_shard + k, last_block), 0))
    out_spec = pl.BlockSpec((None, 8, LANES), lambda s, k: (s, 0, 0))

    kernel = functools.partial(
        _weighted_loss_kernel, alpha=float(alpha), beta=float(beta),
        block_rows=block_rows, steps_per_shard=steps_per_shard,
        rows_valid=rows_valid, tail_cols=tail_cols, mask_from=mask_from,
        grid_blocks=grid_blocks)

    in_bytes = c2.nbytes + a2.nbytes + p2.nbytes
    block_bytes = block_rows * LANES * (
        c2.dtype.itemsize + a2.dtype.itemsize + p2.dtype.itemsize)
    # Double-buffered input blocks + headroom; above v5e's 16 MiB default scoped
    # limit, well under v7x's 64 MiB per-TC VMEM.
    vmem_limit = int(min(max(2 * block_bytes + (4 << 20), 16 << 20), 48 << 20))

    num_p, den_p = pl.pallas_call(
        kernel,
        out_shape=(jax.ShapeDtypeStruct((num_shards, 8, LANES), jnp.float32),
                   jax.ShapeDtypeStruct((num_shards, 8, LANES), jnp.float32)),
        grid_spec=pltpu.PrefetchScalarGridSpec(
            num_scalar_prefetch=0,
            grid=(num_shards, steps_per_shard),
            in_specs=[in_spec, in_spec, in_spec],
            out_specs=[out_spec, out_spec],
        ),
        compiler_params=pltpu.CompilerParams(
            dimension_semantics=("parallel", "arbitrary"),
            vmem_limit_bytes=vmem_limit),
        cost_estimate=pl.CostEstimate(
            flops=7 * n, transcendentals=0,
            bytes_accessed=in_bytes + 2 * num_shards * 8 * LANES * 4),
    )(c2, a2, p2)

    # Final tiny cross-lane reduction + divide in JAX.
    return jnp.sum(num_p) / jnp.sum(den_p)


def weighted_loss_ref(clean, annotated, predicted, alpha=5.0, beta=1.0):
    clean = clean.astype(jnp.float32)
    annotated = annotated.astype(jnp.float32)
    predicted = predicted.astype(jnp.float32)
    arrow_mask = (annotated != clean).astype(jnp.float32)
    weight_map = alpha * arrow_mask + beta * (1.0 - arrow_mask)
    pixel_wise_error = (clean - predicted) ** 2
    weighted_error = weight_map * pixel_wise_error
    return weighted_error.sum() / weight_map.sum()


if __name__ == "__main__":
    key = jax.random.PRNGKey(0)
    k1, k2, k3 = jax.random.split(key, 3)

    # Primary test: shapes implied by the module's forward (small, f32).
    B, C, H, W = 2, 4, 16, 16
    clean = jax.random.normal(k1, (B, C, H, W), jnp.float32)
    mask = jax.random.bernoulli(k2, p=0.2, shape=(B, C, H, W))
    annotated = jnp.where(mask, clean + 1.0, clean)
    predicted = clean + 0.1 * jax.random.normal(k3, (B, C, H, W), jnp.float32)

    loss = jax.block_until_ready(weighted_loss(clean, annotated, predicted))
    ref = weighted_loss_ref(clean, annotated, predicted)
    assert jnp.allclose(loss, ref, rtol=1e-5, atol=1e-6), (loss, ref)

    # Ragged size: exercises the in-kernel tail-mask path (n % 128 != 0).
    k4, k5, k6 = jax.random.split(jax.random.PRNGKey(1), 3)
    shape2 = (2, 3, 17, 19)
    clean2 = jax.random.normal(k4, shape2, jnp.float32)
    mask2 = jax.random.bernoulli(k5, p=0.3, shape=shape2)
    annotated2 = jnp.where(mask2, clean2 - 2.0, clean2)
    predicted2 = clean2 + 0.05 * jax.random.normal(k6, shape2, jnp.float32)

    loss2 = jax.block_until_ready(weighted_loss(clean2, annotated2, predicted2))
    ref2 = weighted_loss_ref(clean2, annotated2, predicted2)
    assert jnp.allclose(loss2, ref2, rtol=1e-5, atol=1e-6), (loss2, ref2)

    # bf16 inputs: exercises native-dtype streaming with in-kernel up-cast.
    clean_b = clean.astype(jnp.bfloat16)
    annotated_b = jnp.where(mask, clean_b + jnp.bfloat16(1.0), clean_b)
    predicted_b = predicted.astype(jnp.bfloat16)
    loss_b = jax.block_until_ready(weighted_loss(clean_b, annotated_b, predicted_b))
    ref_b = weighted_loss_ref(clean_b, annotated_b, predicted_b)
    assert jnp.allclose(loss_b, ref_b, rtol=1e-5, atol=1e-6), (loss_b, ref_b)

    # Multi-block case: exercises the fast (unmasked) path, the accumulator
    # revisit across grid steps, and the partial edge block.
    k7, k8, k9 = jax.random.split(jax.random.PRNGKey(2), 3)
    shape3 = (4, 10, 256, 256)   # 2,621,440 elems = 20480 rows -> 3 blocks of 8192
    clean3 = jax.random.normal(k7, shape3, jnp.float32)
    mask3 = jax.random.bernoulli(k8, p=0.1, shape=shape3)
    annotated3 = jnp.where(mask3, clean3 + 1.0, clean3)
    predicted3 = clean3 + 0.1 * jax.random.normal(k9, shape3, jnp.float32)

    loss3 = jax.block_until_ready(weighted_loss(clean3, annotated3, predicted3))
    ref3 = weighted_loss_ref(clean3, annotated3, predicted3)
    assert jnp.allclose(loss3, ref3, rtol=1e-4, atol=1e-6), (loss3, ref3)

    print("KERNEL_OK")
</pallas_src>

<mosaic_0001>
module attributes {stable_mosaic.version = 11 : i64} {
  func.func @_weighted_loss_kernel(%arg0: i32, %arg1: i32, %arg2: memref<64x128xf32, #tpu.memory_space<vmem>>, %arg3: memref<64x128xf32, #tpu.memory_space<vmem>>, %arg4: memref<64x128xf32, #tpu.memory_space<vmem>>, %arg5: memref<1x8x128xf32, #tpu.memory_space<vmem>>, %arg6: memref<1x8x128xf32, #tpu.memory_space<vmem>>) attributes {dimension_semantics = [#tpu.dimension_semantics<parallel>, #tpu.dimension_semantics<arbitrary>], iteration_bounds = array<i64: 1, 1>, scalar_prefetch = 0 : i64, scratch_operands = 0 : i64, tpu.core_type = #tpu.core_type<tc>, window_params = [{transform_indices = @transform_0, window_bounds = array<i64: 64, 128>}, {transform_indices = @transform_1, window_bounds = array<i64: 64, 128>}, {transform_indices = @transform_2, window_bounds = array<i64: 64, 128>}, {transform_indices = @transform_3, window_bounds = array<i64: 1, 8, 128>}, {transform_indices = @transform_4, window_bounds = array<i64: 1, 8, 128>}]} {
    %c0_i32 = arith.constant 0 : i32
    %0 = arith.cmpi eq, %arg1, %c0_i32 : i32
    %1 = arith.extui %0 : i1 to i32
    %c0_i32_0 = arith.constant 0 : i32
    %2 = arith.cmpi ne, %1, %c0_i32_0 : i32
    scf.if %2 {
      %cst_26 = arith.constant 0.000000e+00 : f32
      %59 = vector.broadcast %cst_26 : f32 to vector<8x128xf32>
      %c0_27 = arith.constant 0 : index
      %c0_28 = arith.constant 0 : index
      %c0_29 = arith.constant 0 : index
      %60 = vector.load %arg5[%c0_27, %c0_28, %c0_29] : memref<1x8x128xf32, #tpu.memory_space<vmem>>, vector<1x8x128xf32>
      %61 = vector.shape_cast %60 : vector<1x8x128xf32> to vector<8x128xf32>
      %62 = vector.shape_cast %59 : vector<8x128xf32> to vector<1x8x128xf32>
      tpu.vector_store %arg5[%c0_27, %c0_28, %c0_29], %62 {strides = array<i32>} : memref<1x8x128xf32, #tpu.memory_space<vmem>>, vector<1x8x128xf32>,
      %cst_30 = arith.constant 0.000000e+00 : f32
      %63 = vector.broadcast %cst_30 : f32 to vector<8x128xf32>
      %c0_31 = arith.constant 0 : index
      %c0_32 = arith.constant 0 : index
      %c0_33 = arith.constant 0 : index
      %64 = vector.load %arg6[%c0_31, %c0_32, %c0_33] : memref<1x8x128xf32, #tpu.memory_space<vmem>>, vector<1x8x128xf32>
      %65 = vector.shape_cast %64 : vector<1x8x128xf32> to vector<8x128xf32>
      %66 = vector.shape_cast %63 : vector<8x128xf32> to vector<1x8x128xf32>
      tpu.vector_store %arg6[%c0_31, %c0_32, %c0_33], %66 {strides = array<i32>} : memref<1x8x128xf32, #tpu.memory_space<vmem>>, vector<1x8x128xf32>,
    } else {
    }
    %c1_i32 = arith.constant 1 : i32
    %3 = arith.muli %arg0, %c1_i32 : i32
    %4 = arith.addi %3, %arg1 : i32
    %cst = arith.constant 0.000000e+00 : f32
    %5 = vector.broadcast %cst : f32 to vector<8x128xf32>
    %c64_i32 = arith.constant 64 : i32
    %6 = arith.muli %4, %c64_i32 : i32
    %c16_i32 = arith.constant 16 : i32
    %7 = arith.subi %c16_i32, %6 : i32
    %cst_1 = arith.constant 5.000000e+00 : f32
    %cst_2 = arith.constant 1.000000e+00 : f32
    %c0_i32_3 = arith.constant 0 : i32
    %c64_i32_4 = arith.constant 64 : i32
    %8 = arith.muli %c0_i32_3, %c64_i32_4 : i32
    %9 = tpu.assume_multiple %8, 64 : i32
    %10 = arith.index_cast %9 : i32 to index
    %c0 = arith.constant 0 : index
    %11 = vector.load %arg2[%10, %c0] : memref<64x128xf32, #tpu.memory_space<vmem>>, vector<64x128xf32>
    %12 = arith.index_cast %9 : i32 to index
    %c0_5 = arith.constant 0 : index
    %13 = vector.load %arg3[%12, %c0_5] : memref<64x128xf32, #tpu.memory_space<vmem>>, vector<64x128xf32>
    %14 = arith.index_cast %9 : i32 to index
    %c0_6 = arith.constant 0 : index
    %15 = vector.load %arg4[%14, %c0_6] : memref<64x128xf32, #tpu.memory_space<vmem>>, vector<64x128xf32>
    %16 = arith.cmpf one, %13, %11 : vector<64x128xf32>
    %17 = vector.broadcast %cst_1 : f32 to vector<64x128xf32>
    %18 = vector.broadcast %cst_2 : f32 to vector<64x128xf32>
    %19 = arith.select %16, %17, %18 : vector<64x128xi1>, vector<64x128xf32>
    %20 = arith.subf %11, %15 : vector<64x128xf32>
    %21 = arith.mulf %20, %20 : vector<64x128xf32>
    %22 = arith.mulf %19, %21 : vector<64x128xf32>
    %23 = tpu.iota {dimensions = array<i32: 0>} : vector<64x128xi32>
    %24 = vector.broadcast %9 : i32 to vector<64x128xi32>
    %25 = arith.addi %24, %23 : vector<64x128xi32>
    %26 = tpu.iota {dimensions = array<i32: 1>} : vector<64x128xi32>
    %c1_i32_7 = arith.constant 1 : i32
    %27 = arith.subi %7, %c1_i32_7 : i32
    %28 = vector.broadcast %27 : i32 to vector<64x128xi32>
    %29 = arith.cmpi slt, %25, %28 : vector<64x128xi32>
    %c1_i32_8 = arith.constant 1 : i32
    %30 = arith.subi %7, %c1_i32_8 : i32
    %31 = vector.broadcast %30 : i32 to vector<64x128xi32>
    %32 = arith.cmpi eq, %25, %31 : vector<64x128xi32>
    %c128_i32 = arith.constant 128 : i32
    %33 = vector.broadcast %c128_i32 : i32 to vector<64x128xi32>
    %34 = arith.cmpi slt, %26, %33 : vector<64x128xi32>
    %35 = arith.andi %32, %34 : vector<64x128xi1>
    %36 = arith.ori %29, %35 : vector<64x128xi1>
    %cst_9 = arith.constant 0.000000e+00 : f32
    %37 = vector.broadcast %cst_9 : f32 to vector<64x128xf32>
    %38 = arith.select %36, %19, %37 : vector<64x128xi1>, vector<64x128xf32>
    %cst_10 = arith.constant 0.000000e+00 : f32
    %39 = vector.broadcast %cst_10 : f32 to vector<64x128xf32>
    %40 = arith.select %36, %22, %39 : vector<64x128xi1>, vector<64x128xf32>
    %41 = vector.shape_cast %40 : vector<64x128xf32> to vector<8x8x128xf32>
    %cst_11 = arith.constant dense<0.000000e+00> : vector<8x128xf32>
    %42 = vector.multi_reduction <add>, %41, %cst_11 [0] : vector<8x8x128xf32> to vector<8x128xf32>
    %43 = arith.addf %5, %42 : vector<8x128xf32>
    %44 = vector.shape_cast %38 : vector<64x128xf32> to vector<8x8x128xf32>
    %cst_12 = arith.constant dense<0.000000e+00> : vector<8x128xf32>
    %45 = vector.multi_reduction <add>, %44, %cst_12 [0] : vector<8x8x128xf32> to vector<8x128xf32>
    %46 = arith.addf %5, %45 : vector<8x128xf32>
    %c1_i32_13 = arith.constant 1 : i32
    %c0_14 = arith.constant 0 : index
    %c0_15 = arith.constant 0 : index
    %c0_16 = arith.constant 0 : index
    %47 = vector.load %arg5[%c0_14, %c0_15, %c0_16] : memref<1x8x128xf32, #tpu.memory_space<vmem>>, vector<1x8x128xf32>
    %48 = vector.shape_cast %47 : vector<1x8x128xf32> to vector<8x128xf32>
    %49 = arith.addf %48, %43 : vector<8x128xf32>
    %c0_17 = arith.constant 0 : index
    %c0_18 = arith.constant 0 : index
    %c0_19 = arith.constant 0 : index
    %50 = vector.load %arg5[%c0_17, %c0_18, %c0_19] : memref<1x8x128xf32, #tpu.memory_space<vmem>>, vector<1x8x128xf32>
    %51 = vector.shape_cast %50 : vector<1x8x128xf32> to vector<8x128xf32>
    %52 = vector.shape_cast %49 : vector<8x128xf32> to vector<1x8x128xf32>
    tpu.vector_store %arg5[%c0_17, %c0_18, %c0_19], %52 {strides = array<i32>} : memref<1x8x128xf32, #tpu.memory_space<vmem>>, vector<1x8x128xf32>,
    %c0_20 = arith.constant 0 : index
    %c0_21 = arith.constant 0 : index
    %c0_22 = arith.constant 0 : index
    %53 = vector.load %arg6[%c0_20, %c0_21, %c0_22] : memref<1x8x128xf32, #tpu.memory_space<vmem>>, vector<1x8x128xf32>
    %54 = vector.shape_cast %53 : vector<1x8x128xf32> to vector<8x128xf32>
    %55 = arith.addf %54, %46 : vector<8x128xf32>
    %c0_23 = arith.constant 0 : index
    %c0_24 = arith.constant 0 : index
    %c0_25 = arith.constant 0 : index
    %56 = vector.load %arg6[%c0_23, %c0_24, %c0_25] : memref<1x8x128xf32, #tpu.memory_space<vmem>>, vector<1x8x128xf32>
    %57 = vector.shape_cast %56 : vector<1x8x128xf32> to vector<8x128xf32>
    %58 = vector.shape_cast %55 : vector<8x128xf32> to vector<1x8x128xf32>
    tpu.vector_store %arg6[%c0_23, %c0_24, %c0_25], %58 {strides = array<i32>} : memref<1x8x128xf32, #tpu.memory_space<vmem>>, vector<1x8x128xf32>,
    return
  }
  func.func @transform_0(%arg0: i32, %arg1: i32) -> (i32, i32) {
    %c1_i32 = arith.constant 1 : i32
    %0 = arith.muli %arg0, %c1_i32 : i32
    %1 = arith.addi %0, %arg1 : i32
    %c0_i32 = arith.constant 0 : i32
    %2 = arith.minsi %1, %c0_i32 : i32
    %c0_i32_0 = arith.constant 0 : i32
    %c0_i32_1 = arith.constant 0 : i32
    return %2, %c0_i32_0 : i32, i32
  }
  func.func @transform_1(%arg0: i32, %arg1: i32) -> (i32, i32) {
    %c1_i32 = arith.constant 1 : i32
    %0 = arith.muli %arg0, %c1_i32 : i32
    %1 = arith.addi %0, %arg1 : i32
    %c0_i32 = arith.constant 0 : i32
    %2 = arith.minsi %1, %c0_i32 : i32
    %c0_i32_0 = arith.constant 0 : i32
    %c0_i32_1 = arith.constant 0 : i32
    return %2, %c0_i32_0 : i32, i32
  }
  func.func @transform_2(%arg0: i32, %arg1: i32) -> (i32, i32) {
    %c1_i32 = arith.constant 1 : i32
    %0 = arith.muli %arg0, %c1_i32 : i32
    %1 = arith.addi %0, %arg1 : i32
    %c0_i32 = arith.constant 0 : i32
    %2 = arith.minsi %1, %c0_i32 : i32
    %c0_i32_0 = arith.constant 0 : i32
    %c0_i32_1 = arith.constant 0 : i32
    return %2, %c0_i32_0 : i32, i32
  }
  func.func @transform_3(%arg0: i32, %arg1: i32) -> (i32, i32, i32) {
    %c0_i32 = arith.constant 0 : i32
    %c0_i32_0 = arith.constant 0 : i32
    %c0_i32_1 = arith.constant 0 : i32
    return %arg0, %c0_i32, %c0_i32_0 : i32, i32, i32
  }
  func.func @transform_4(%arg0: i32, %arg1: i32) -> (i32, i32, i32) {
    %c0_i32 = arith.constant 0 : i32
    %c0_i32_0 = arith.constant 0 : i32
    %c0_i32_1 = arith.constant 0 : i32
    return %arg0, %c0_i32, %c0_i32_0 : i32, i32, i32
  }
}

</mosaic_0001>

<bundles_post_ra>
// kernel: tpu_custom_call.1
= control target key start
LH: loop header
LB: loop body
LE: loop exit
PB: predicated region body
PF: predicated region fallthrough
CT: control target
= control target key end

     0   :  { %10 = vsyncpa [#allocation3], 0  ;;  %s534_s0 = inlined_call_operand.hbm [shape: f32[64,128], index: 0, kind: input, shape index: {}]   ;;  %s535_s1 = inlined_call_operand.hbm [shape: f32[64,128], index: 1, kind: input, shape index: {}]   ;;  %s536_s2 = inlined_call_operand.hbm [shape: f32[64,128], index: 2, kind: input, shape index: {}]   ;;  %s537_s3 = inlined_call_operand.hbm [shape: f32[1,8,128], index: 3, kind: output, shape index: {0}]   ;;  %s538_s4 = inlined_call_operand.hbm [shape: f32[1,8,128], index: 4, kind: output, shape index: {1}]  }
   0x1   :  { %11 = vsyncpa [#allocation6], 0 }
   0x2   :  { %12 = vsyncpa [#allocation4], 0 }
   0x3   :  { %13 = vsyncpa [#allocation10], 0  ;;  %s417_s15 = smov [#allocation5]   ;;  %s418_s17 = smov [#allocation2]  }
   0x4   :  { %s43_s16 = sshll.u32 %s417_s15, 4  ;;  %s25_s18 = sshll.u32 %s418_s17, 4  ;;  %s44_s16 = int_to_ptr.vmem [resolvable:$true] %s43_s16  ;;  %s450_s18 = int_to_ptr.vmem [resolvable:$true] %s25_s18 }
   0x5   :  { %s299_s21 = scalar_lea.hbm %s535_s1, 1024 }
   0x6   :  { %p300_p0 = scmp.ne.s32.totalorder %s535_s1, %s299_s21  ;;  %p303_p1 = scmp.lt.u32.totalorder %s299_s21, %s535_s1 }
   0x8   :  { %p305_p2 = pnand %p303_p1, %p300_p0 }
   0xa   :  { %308 = shalt.err (!%p305_p2)
}
   0xb   :  { %s309_s26 = scalar_lea.vmem %s44_s16, 1024  ;;  %p314_p4 = scmp.lt.s32.totalorder %s44_s16, %s44_s16 }
   0xc   :  { %p310_p3 = scmp.ne.s32.totalorder %s44_s16, %s309_s26  ;;  %p315_p5 = scmp.lt.s32.totalorder %s309_s26, %s309_s26 }
   0xe   :  { %p316_p6 = por %p315_p5, %p314_p4 }
  0x10   :  { %p317_p7 = pnand %p316_p6, %p310_p3 }
  0x12   :  { %320 = shalt.err (!%p317_p7)
}
  0x13   :  { %s419_s27 = smov 128   ;;  %s420_s28 = smov 8  }
  0x14   :  { %49 = dma.hbm_to_vmem [thread:$0]  %s535_s1, 1024, %s44_s16, [#allocation6], %s419_s27, %s419_s27, %s420_s28  }
  0x15   :  { %s321_s7 = scalar_lea.hbm %s534_s0, 1024 }
  0x16   :  { %p322_p8 = scmp.ne.s32.totalorder %s534_s0, %s321_s7  ;;  %p325_p9 = scmp.lt.u32.totalorder %s321_s7, %s534_s0 }
  0x18   :  { %p327_p10 = pnand %p325_p9, %p322_p8 }
  0x1a   :  { %330 = shalt.err (!%p327_p10)
}
  0x1b   :  { %s331_s12 = scalar_lea.vmem %s450_s18, 1024  ;;  %p336_p12 = scmp.lt.s32.totalorder %s450_s18, %s450_s18 }
  0x1c   :  { %p332_p11 = scmp.ne.s32.totalorder %s450_s18, %s331_s12  ;;  %p337_p13 = scmp.lt.s32.totalorder %s331_s12, %s331_s12 }
  0x1e   :  { %p338_p0 = por %p337_p13, %p336_p12 }
  0x20   :  { %p339_p1 = pnand %p338_p0, %p332_p11 }
  0x22   :  { %342 = shalt.err (!%p339_p1)
}
  0x23   :  { %31 = dma.hbm_to_vmem [thread:$0]  %s534_s0, 1024, %s450_s18, [#allocation3], %s419_s27, %s419_s27, %s420_s28  }
  0x24   :  { %s421_s14 = smov [#allocation7]   ;;  %s343_s19 = scalar_lea.hbm %s536_s2, 1024 }
  0x25   :  { %s61_s15 = sshll.u32 %s421_s14, 4  ;;  %p344_p2 = scmp.ne.s32.totalorder %s536_s2, %s343_s19  ;;  %s62_s15 = int_to_ptr.vmem [resolvable:$true] %s61_s15 }
  0x26   :  { %p347_p3 = scmp.lt.u32.totalorder %s343_s19, %s536_s2 }
  0x28   :  { %p349_p4 = pnand %p347_p3, %p344_p2 }
  0x2a   :  { %352 = shalt.err (!%p349_p4)
}
  0x2b   :  { %s353_s24 = scalar_lea.vmem %s62_s15, 1024  ;;  %p358_p6 = scmp.lt.s32.totalorder %s62_s15, %s62_s15 }
  0x2c   :  { %p354_p5 = scmp.ne.s32.totalorder %s62_s15, %s353_s24  ;;  %p359_p7 = scmp.lt.s32.totalorder %s353_s24, %s353_s24 }
  0x2e   :  { %p360_p8 = por %p359_p7, %p358_p6 }
  0x30   :  { %p361_p9 = pnand %p360_p8, %p354_p5 }
  0x32   :  { %364 = shalt.err (!%p361_p9)
}
  0x33   :  { %67 = dma.hbm_to_vmem [thread:$0]  %s536_s2, 1024, %s62_s15, [#allocation6], %s419_s27, %s419_s27, %s420_s28  }
  0x34   :  { %409 = dma.done.wait [#allocation3], 1024  }
  0x35   :  { %410 = vsyncadd [#allocation3], 4294966272 }
  0x36   :  { %411 = dma.done.wait [#allocation6], 2048  }
  0x37   :  { %412 = vsyncadd [#allocation6], 4294965248  ;;  %v161_v0 = vlaneseq  ;;  %v97_v3 = vld [vmem:[#allocation2] sm:$0xff]  ;;  %v98_v4 = vld [vmem:[#allocation2 + $0x8] sm:$0xff]  ;;  %v422_v12 = vmov 1.0   ;;  %s423_s2 = smov [#allocation9]  }
  0x38   :  { %v105_v5 = vld [vmem:[#allocation5] sm:$0xff]  ;;  %v106_v6 = vld [vmem:[#allocation5 + $0x8] sm:$0xff]  ;;  %s270_s25 = sshll.u32 %s423_s2, 4  ;;  %s424_s26 = smov [#allocation8]   ;;  %s271_s25 = int_to_ptr.vmem [resolvable:$true] %s270_s25 }
  0x39   :  { %v162_v1 = vshrl.u32 %v161_v0, 7  ;;  %v113_v7 = vld [vmem:[#allocation7] sm:$0xff]  ;;  %v114_v8 = vld [vmem:[#allocation7 + $0x8] sm:$0xff]  ;;  %vm121_vm2 = vcmp.ne.f32.partialorder %v105_v5, %v97_v3  ;;  %vm122_vm3 = vcmp.ne.f32.partialorder %v106_v6, %v98_v4  ;;  %s260_s27 = sshll.u32 %s424_s26, 4  ;;  %s365_s28 = scalar_lea.vmem %s271_s25, 128  ;;  %s261_s27 = int_to_ptr.vmem [resolvable:$true] %s260_s27 }
  0x3a   :  { %v137_v9 = vsub.f32 %v97_v3, %v113_v7  ;;  %v138_v10 = vsub.f32 %v98_v4, %v114_v8  ;;  %v129_v13 = vsel %vm121_vm2, 5.0, %v422_v12  ;;  %v130_v14 = vsel %vm122_vm3, 5.0, %v422_v12  ;;  %p366_p10 = scmp.ne.s32.totalorder %s271_s25, %s365_s28  ;;  %p370_p11 = scmp.lt.s32.totalorder %s271_s25, %s271_s25 }
  0x3b   :  { %v163_v2 = vadd.s32 8, %v162_v1  ;;  %p371_p12 = scmp.lt.s32.totalorder %s365_s28, %s365_s28 }
  0x3c   :  { %v145_v15 = vmul.f32 %v137_v9, %v137_v9  ;;  %v146_v16 = vmul.f32 %v138_v10, %v138_v10 }
  0x3d   :  { %vm184_vm0 = vcmp.lt.s32.totalorder %v163_v2, 15  ;;  %vm192_vm1 = vcmp.eq.s32.totalorder %v163_v2, 15  ;;  %p372_p13 = por %p371_p12, %p370_p11 }
  0x3e   :  { %vm502_vm4 = vmor %vm184_vm0, %vm192_vm1  ;;  %v153_v19 = vmul.f32 %v145_v15, %v129_v13  ;;  %v154_v20 = vmul.f32 %v146_v16, %v130_v14 }
  0x3f   :  { %v217_v17 = vsel %vm502_vm4, %v130_v14, 0.0  ;;  %p373_p0 = pnand %p372_p13, %p366_p10 }
  0x40   :  { %v240_v18 = vadd.f32 %v217_v17, %v129_v13  ;;  %v225_v21 = vsel %vm502_vm4, %v154_v20, 0.0 }
  0x41   :  { %v232_v22 = vadd.f32 %v225_v21, %v153_v19 }
  0x42   :  { %253 = vst [vmem:[#allocation9] sm:$0xff] %v240_v18 }
  0x43   :  { %376 = shalt.err (!%p373_p0)
}
  0x44   :  { %s377_s5 = scalar_lea.hbm %s538_s4, 128 }
  0x45   :  { %p378_p1 = scmp.ne.s32.totalorder %s538_s4, %s377_s5  ;;  %p381_p2 = scmp.lt.u32.totalorder %s377_s5, %s538_s4 }
  0x47   :  { %p383_p3 = pnand %p381_p2, %p378_p1 }
  0x49   :  { %386 = shalt.err (!%p383_p3)
}
  0x4a   :  { %273 = dma.vmem_to_hbm [thread:$0]  %s271_s25, 128, %s538_s4, [#allocation10]   ;;  %250 = vst [vmem:[#allocation8] sm:$0xff] %v232_v22 }
  0x4b   :  { %s387_s12 = scalar_lea.vmem %s261_s27, 128  ;;  %p392_p5 = scmp.lt.s32.totalorder %s261_s27, %s261_s27 }
  0x4c   :  { %p388_p4 = scmp.ne.s32.totalorder %s261_s27, %s387_s12  ;;  %p393_p6 = scmp.lt.s32.totalorder %s387_s12, %s387_s12 }
  0x4e   :  { %p394_p7 = por %p393_p6, %p392_p5 }
  0x50   :  { %p395_p8 = pnand %p394_p7, %p388_p4 }
  0x52   :  { %398 = shalt.err (!%p395_p8)
}
  0x53   :  { %s399_s14 = scalar_lea.hbm %s537_s3, 128 }
  0x54   :  { %p400_p9 = scmp.ne.s32.totalorder %s537_s3, %s399_s14  ;;  %p403_p10 = scmp.lt.u32.totalorder %s399_s14, %s537_s3 }
  0x56   :  { %p405_p11 = pnand %p403_p10, %p400_p9 }
  0x58   :  { %408 = shalt.err (!%p405_p11)
}
  0x59   :  { %263 = dma.vmem_to_hbm [thread:$0]  %s261_s27, 128, %s537_s3, [#allocation4]  }
  0x5a   :  { %413 = dma.done.wait [#allocation4], 128  }
  0x5b   :  { %414 = vsyncadd [#allocation4], 4294967168 }
  0x5c   :  { %415 = dma.done.wait [#allocation10], 128  }
  0x5d   :  { %416 = vsyncadd [#allocation10], 4294967168 }
  0x5e   :  { %280 = vsyncpa [#allocation3], 1 }
  0x5f   :  { %281 = vsyncpa [#allocation6], 1 }
  0x60   :  { %282 = vsyncpa [#allocation4], 1 }
  0x61   :  { %283 = vsyncpa [#allocation10], 1 }

</bundles_post_ra>
